<compile_context>
chip_gen: v5e
topology: v5e:2x2
jax: 0.10.0
libtpu: 0.0.40
codegen_flags: <defaults>
</compile_context>

<pallas_src>
import math

import jax
import jax.numpy as jnp
from jax.experimental import pallas as pl
from jax.experimental.pallas import tpu as pltpu

PAD = 128            # lane-aligned width used for every hidden dimension
BIAS_ROW = PAD       # row index of the bias inside each layer's packed slab
SLAB_ROWS = PAD + 8  # 128 weight rows + 1 bias row, padded up to a sublane multiple


def _round_up(x, m):
    return ((x + m - 1) // m) * m


def _make_actor_kernel(input_dims, n_actions):
    vpu_head = (n_actions == 1)

    def kernel(x_ref, p_ref, out_ref):
        x = x_ref[...]                                        # (TILE_B, input_dims)

        # fc1: contract over the real input rows of the packed slab (no wrapper pad).
        h = jnp.dot(x, p_ref[0, :input_dims, :],
                    preferred_element_type=jnp.float32)
        h = h + p_ref[0, BIAS_ROW:BIAS_ROW + 1, :]
        h = jnp.maximum(h, 0.01 * h)                          # leaky_relu

        # fc2 (leaky_relu) and fc3 (relu) on the MXU; weights are static views
        # into the VMEM-resident slab (no extra DMAs).
        for layer, leaky in ((1, True), (2, False)):
            w = p_ref[layer, :PAD, :]                         # (PAD, PAD)
            b = p_ref[layer, BIAS_ROW:BIAS_ROW + 1, :]        # (1, PAD)
            h = jnp.dot(h, w, preferred_element_type=jnp.float32) + b
            h = jnp.maximum(h, 0.01 * h) if leaky else jnp.maximum(h, 0.0)
        # dropout(p=0.0) is the identity in both train and eval mode.

        if vpu_head:
            # fc4 with a single output unit: VPU multiply + XLU lane reduction.
            w4 = p_ref[3, 0:1, :]                             # (1, PAD) = W4^T row
            b4 = p_ref[3, BIAS_ROW:BIAS_ROW + 1, 0:1]         # (1, 1) scalar bias
            s = jnp.sum(h * w4, axis=-1, keepdims=True)       # (TILE_B, 1)
            a = jnp.tanh(s + b4)                              # (TILE_B, 1)
        else:
            w4 = p_ref[3, :PAD, :]
            b4 = p_ref[3, BIAS_ROW:BIAS_ROW + 1, :]
            full = jnp.tanh(jnp.dot(h, w4, preferred_element_type=jnp.float32) + b4)
            a = full[:, :n_actions]                           # (TILE_B, n_actions)

        out_ref[...] = a.astype(out_ref.dtype)                # narrow store

    return kernel


def pack_params(params):
    """Pack [(W, b)] * 4 (W: (in, out), b: (out,)) into one (4, 136, 128) f32 slab."""
    n_layers = len(params)
    packed = jnp.zeros((n_layers, SLAB_ROWS, PAD), jnp.float32)
    for layer, (w, b) in enumerate(params):
        w = jnp.asarray(w, jnp.float32)
        b = jnp.reshape(jnp.asarray(b, jnp.float32), (-1,))
        din, dout = w.shape
        if layer == n_layers - 1 and dout == 1:
            # Head weight stored transposed as a lane-dense row (VPU head path).
            packed = packed.at[layer, 0, :din].set(w[:, 0])
            packed = packed.at[layer, BIAS_ROW, :].set(b[0])
        else:
            packed = packed.at[layer, :din, :dout].set(w)
            packed = packed.at[layer, BIAS_ROW, :dout].set(b)
    return packed


def actor_forward(state, params, *, dropout_p=0.0, max_tile_b=1024):
    """state: (B, input_dims) float32; params: list of 4 (W, b) with W shaped (in, out)."""
    assert dropout_p == 0.0, "kernel implements nn.Dropout(p=0.0) as identity"
    B, input_dims = state.shape
    n_actions = params[-1][0].shape[1]

    packed = pack_params(params)

    tile_b = min(_round_up(max(B, 8), 8), max_tile_b)
    if B >= 16:
        # Keep >= 2 grid steps so ("parallel",) can shard across v7x's two
        # TensorCores.  (Single-TC v5e/v6e: still near-max tile sizes.)
        tile_b = min(tile_b, _round_up(pl.cdiv(B, 2), 8))
    b_pad = _round_up(B, tile_b)

    x = state.astype(jnp.float32)
    if b_pad != B:
        # Row-only pad (narrow: input_dims wide), only when B % tile_b != 0.
        x = jnp.zeros((b_pad, input_dims), jnp.float32).at[:B].set(x)

    out = pl.pallas_call(
        _make_actor_kernel(input_dims, n_actions),
        out_shape=jax.ShapeDtypeStruct((b_pad, n_actions), jnp.float32),
        grid_spec=pltpu.PrefetchScalarGridSpec(
            num_scalar_prefetch=0,
            grid=(b_pad // tile_b,),
            in_specs=[
                # State streamed at its natural width (last dim = full extent).
                pl.BlockSpec((tile_b, input_dims), lambda i: (i, 0)),
                # Same block every step -> weights stay VMEM-resident, no re-DMA.
                pl.BlockSpec((len(params), SLAB_ROWS, PAD), lambda i: (0, 0, 0)),
            ],
            out_specs=pl.BlockSpec((tile_b, n_actions), lambda i: (i, 0)),
        ),
        compiler_params=pltpu.CompilerParams(
            dimension_semantics=("parallel",)),
    )(x, packed)

    return out if b_pad == B else out[:B]


def actor_reference(state, params):
    """Pure-JAX reference matching the PyTorch forward."""
    (w1, b1), (w2, b2), (w3, b3), (w4, b4) = params
    lrelu = lambda v: jnp.where(v >= 0, v, 0.01 * v)
    h = lrelu(state @ w1 + jnp.reshape(b1, (1, -1)))
    h = lrelu(h @ w2 + jnp.reshape(b2, (1, -1)))
    h = jnp.maximum(h @ w3 + jnp.reshape(b3, (1, -1)), 0.0)
    return jnp.tanh(h @ w4 + jnp.reshape(b4, (1, -1)))


def init_linear(key, fan_in, fan_out):
    """Deterministic PyTorch-style nn.Linear init (uniform +/- 1/sqrt(fan_in))."""
    kw, kb = jax.random.split(key)
    bound = 1.0 / math.sqrt(fan_in)
    w = jax.random.uniform(kw, (fan_in, fan_out), jnp.float32, -bound, bound)
    b = jax.random.uniform(kb, (fan_out,), jnp.float32, -bound, bound)
    return w, b


def make_params(key, input_dims=11, n_actions=1, hidden_layers=(64, 32, 32)):
    dims = [input_dims, *hidden_layers, n_actions]
    keys = jax.random.split(key, len(dims) - 1)
    return [init_linear(k, dims[i], dims[i + 1]) for i, k in enumerate(keys)]


if __name__ == "__main__":
    key = jax.random.PRNGKey(0)
    k_params, k_state = jax.random.split(key)

    input_dims, n_actions = 11, 1
    batch = 8

    params = make_params(k_params, input_dims=input_dims, n_actions=n_actions)
    state = jax.random.normal(k_state, (batch, input_dims), dtype=jnp.float32)

    action = actor_forward(state, params)
    jax.block_until_ready(action)

    ref = actor_reference(state, params)
    assert action.shape == (batch, n_actions)
    assert bool(jnp.all(jnp.abs(action) <= 1.0))              # tanh output range
    assert bool(jnp.allclose(action, ref, atol=1e-5, rtol=1e-5)), \
        float(jnp.max(jnp.abs(action - ref)))
    print("KERNEL_OK")
</pallas_src>

<mosaic_0001>
module attributes {stable_mosaic.version = 11 : i64} {
  func.func @kernel(%arg0: i32, %arg1: memref<8x11xf32, #tpu.memory_space<vmem>>, %arg2: memref<4x136x128xf32, #tpu.memory_space<vmem>>, %arg3: memref<8x1xf32, #tpu.memory_space<vmem>>) attributes {dimension_semantics = [#tpu.dimension_semantics<parallel>], iteration_bounds = array<i64: 1>, scalar_prefetch = 0 : i64, scratch_operands = 0 : i64, tpu.core_type = #tpu.core_type<tc>, window_params = [{transform_indices = @transform_0, window_bounds = array<i64: 8, 11>}, {pipeline_mode = #tpu.pipeline_mode<synchronous>, transform_indices = @transform_1, window_bounds = array<i64: 4, 136, 128>}, {transform_indices = @transform_2, window_bounds = array<i64: 8, 1>}]} {
    %c0 = arith.constant 0 : index
    %c0_0 = arith.constant 0 : index
    %0 = vector.load %arg1[%c0, %c0_0] : memref<8x11xf32, #tpu.memory_space<vmem>>, vector<8x11xf32>
    %c0_1 = arith.constant 0 : index
    %c0_2 = arith.constant 0 : index
    %c0_3 = arith.constant 0 : index
    %1 = vector.load %arg2[%c0_1, %c0_2, %c0_3] : memref<4x136x128xf32, #tpu.memory_space<vmem>>, vector<1x11x128xf32>
    %2 = vector.shape_cast %1 : vector<1x11x128xf32> to vector<11x128xf32>
    %cst = arith.constant dense<0.000000e+00> : vector<8x128xf32>
    %3 = tpu.matmul %0, %2, %cst {dimension_numbers = #tpu.dot_dimension_numbers<[1], [0], [0], [1], [0, 0, 1, 1], [], []>} : vector<8x11xf32>, vector<11x128xf32>, vector<8x128xf32> -> vector<8x128xf32>
    %c0_4 = arith.constant 0 : index
    %c128 = arith.constant 128 : index
    %c0_5 = arith.constant 0 : index
    %4 = vector.load %arg2[%c0_4, %c128, %c0_5] : memref<4x136x128xf32, #tpu.memory_space<vmem>>, vector<1x1x128xf32>
    %5 = vector.shape_cast %4 : vector<1x1x128xf32> to vector<1x128xf32>
    %6 = vector.broadcast %5 : vector<1x128xf32> to vector<8x128xf32>
    %7 = arith.addf %3, %6 : vector<8x128xf32>
    %cst_6 = arith.constant 0.00999999977 : f32
    %8 = vector.broadcast %cst_6 : f32 to vector<8x128xf32>
    %9 = arith.mulf %8, %7 : vector<8x128xf32>
    %10 = arith.maximumf %7, %9 : vector<8x128xf32>
    %c1 = arith.constant 1 : index
    %c0_7 = arith.constant 0 : index
    %c0_8 = arith.constant 0 : index
    %11 = vector.load %arg2[%c1, %c0_7, %c0_8] : memref<4x136x128xf32, #tpu.memory_space<vmem>>, vector<1x128x128xf32>
    %12 = vector.shape_cast %11 : vector<1x128x128xf32> to vector<128x128xf32>
    %c1_9 = arith.constant 1 : index
    %c128_10 = arith.constant 128 : index
    %c0_11 = arith.constant 0 : index
    %13 = vector.load %arg2[%c1_9, %c128_10, %c0_11] : memref<4x136x128xf32, #tpu.memory_space<vmem>>, vector<1x1x128xf32>
    %14 = vector.shape_cast %13 : vector<1x1x128xf32> to vector<1x128xf32>
    %cst_12 = arith.constant dense<0.000000e+00> : vector<8x128xf32>
    %15 = tpu.matmul %10, %12, %cst_12 {dimension_numbers = #tpu.dot_dimension_numbers<[1], [0], [0], [1], [0, 0, 1, 1], [], []>} : vector<8x128xf32>, vector<128x128xf32>, vector<8x128xf32> -> vector<8x128xf32>
    %16 = vector.broadcast %14 : vector<1x128xf32> to vector<8x128xf32>
    %17 = arith.addf %15, %16 : vector<8x128xf32>
    %cst_13 = arith.constant 0.00999999977 : f32
    %18 = vector.broadcast %cst_13 : f32 to vector<8x128xf32>
    %19 = arith.mulf %18, %17 : vector<8x128xf32>
    %20 = arith.maximumf %17, %19 : vector<8x128xf32>
    %c2 = arith.constant 2 : index
    %c0_14 = arith.constant 0 : index
    %c0_15 = arith.constant 0 : index
    %21 = vector.load %arg2[%c2, %c0_14, %c0_15] : memref<4x136x128xf32, #tpu.memory_space<vmem>>, vector<1x128x128xf32>
    %22 = vector.shape_cast %21 : vector<1x128x128xf32> to vector<128x128xf32>
    %c2_16 = arith.constant 2 : index
    %c128_17 = arith.constant 128 : index
    %c0_18 = arith.constant 0 : index
    %23 = vector.load %arg2[%c2_16, %c128_17, %c0_18] : memref<4x136x128xf32, #tpu.memory_space<vmem>>, vector<1x1x128xf32>
    %24 = vector.shape_cast %23 : vector<1x1x128xf32> to vector<1x128xf32>
    %cst_19 = arith.constant dense<0.000000e+00> : vector<8x128xf32>
    %25 = tpu.matmul %20, %22, %cst_19 {dimension_numbers = #tpu.dot_dimension_numbers<[1], [0], [0], [1], [0, 0, 1, 1], [], []>} : vector<8x128xf32>, vector<128x128xf32>, vector<8x128xf32> -> vector<8x128xf32>
    %26 = vector.broadcast %24 : vector<1x128xf32> to vector<8x128xf32>
    %27 = arith.addf %25, %26 : vector<8x128xf32>
    %cst_20 = arith.constant 0.000000e+00 : f32
    %28 = vector.broadcast %cst_20 : f32 to vector<8x128xf32>
    %29 = arith.maximumf %27, %28 : vector<8x128xf32>
    %c3 = arith.constant 3 : index
    %c0_21 = arith.constant 0 : index
    %c0_22 = arith.constant 0 : index
    %30 = vector.load %arg2[%c3, %c0_21, %c0_22] : memref<4x136x128xf32, #tpu.memory_space<vmem>>, vector<1x1x128xf32>
    %31 = vector.shape_cast %30 : vector<1x1x128xf32> to vector<1x128xf32>
    %c3_23 = arith.constant 3 : index
    %c128_24 = arith.constant 128 : index
    %c0_25 = arith.constant 0 : index
    %32 = vector.load %arg2[%c3_23, %c128_24, %c0_25] : memref<4x136x128xf32, #tpu.memory_space<vmem>>, vector<1x1x1xf32>
    %33 = vector.shape_cast %32 : vector<1x1x1xf32> to vector<1x1xf32>
    %34 = vector.broadcast %31 : vector<1x128xf32> to vector<8x128xf32>
    %35 = arith.mulf %29, %34 : vector<8x128xf32>
    %cst_26 = arith.constant dense<0.000000e+00> : vector<8xf32>
    %36 = vector.multi_reduction <add>, %35, %cst_26 [1] : vector<8x128xf32> to vector<8xf32>
    %37 = vector.shape_cast %36 : vector<8xf32> to vector<8x1xf32>
    %38 = vector.broadcast %33 : vector<1x1xf32> to vector<8x1xf32>
    %39 = arith.addf %37, %38 : vector<8x1xf32>
    %40 = math.tanh %39 : vector<8x1xf32>
    %c0_27 = arith.constant 0 : index
    %c0_28 = arith.constant 0 : index
    %41 = vector.load %arg3[%c0_27, %c0_28] : memref<8x1xf32, #tpu.memory_space<vmem>>, vector<8x1xf32>
    tpu.vector_store %arg3[%c0_27, %c0_28], %40 {strides = array<i32>} : memref<8x1xf32, #tpu.memory_space<vmem>>, vector<8x1xf32>,
    return
  }
  func.func @transform_0(%arg0: i32) -> (i32, i32) {
    %c0_i32 = arith.constant 0 : i32
    %c0_i32_0 = arith.constant 0 : i32
    return %arg0, %c0_i32 : i32, i32
  }
  func.func @transform_1(%arg0: i32) -> (i32, i32, i32) {
    %c0_i32 = arith.constant 0 : i32
    %c0_i32_0 = arith.constant 0 : i32
    %c0_i32_1 = arith.constant 0 : i32
    %c0_i32_2 = arith.constant 0 : i32
    return %c0_i32, %c0_i32_0, %c0_i32_1 : i32, i32, i32
  }
  func.func @transform_2(%arg0: i32) -> (i32, i32) {
    %c0_i32 = arith.constant 0 : i32
    %c0_i32_0 = arith.constant 0 : i32
    return %arg0, %c0_i32 : i32, i32
  }
}

</mosaic_0001>

<bundles_post_ra>
// kernel: tpu_custom_call.1
= control target key start
LH: loop header
LB: loop body
LE: loop exit
PB: predicated region body
PF: predicated region fallthrough
CT: control target
= control target key end

     0   :  { %7 = vsyncpa [#allocation3], 0  ;;  %s268_s0 = inlined_call_operand.hbm [shape: f32[8,11], index: 0, kind: input, shape index: {}]   ;;  %s269_s1 = inlined_call_operand.hbm [shape: f32[4,136,128], index: 1, kind: input, shape index: {}]   ;;  %s270_s2 = inlined_call_operand.vmem [shape: f32[8,1], index: 2, kind: output, shape index: {}]  }
   0x1   :  { %s14_s11 = sshll.u32 %s268_s0, 4  ;;  %s15_s11 = int_to_ptr.hbm [resolvable:$true] %s14_s11 }
   0x2   :  { %8 = vsyncpa [#allocation5], 0  ;;  %s240_s12 = smov [#allocation2]   ;;  %s24_s16 = sshll.u32 %s269_s1, 4  ;;  %s25_s16 = int_to_ptr.hbm [resolvable:$true] %s24_s16 }
   0x3   :  { %s16_s13 = sshll.u32 %s240_s12, 4  ;;  %s241_s17 = smov [#allocation4]   ;;  %s17_s13 = int_to_ptr.vmem [resolvable:$true] %s16_s13 }
   0x4   :  { %19 = dma.hbm_to_vmem [thread:$0]  %s15_s11, 128, %s17_s13, [#allocation3]  }
   0x5   :  { %s26_s18 = sshll.u32 %s241_s17, 4  ;;  %s242_s19 = smov 128   ;;  %s27_s18 = int_to_ptr.vmem [resolvable:$true] %s26_s18 }
   0x6   :  { %s243_s20 = smov 8  }
   0x7   :  { %32 = dma.hbm_to_vmem [thread:$0]  %s25_s16, 8704, %s27_s18, [#allocation5], %s242_s19, %s242_s19, %s243_s20  }
   0x8   :  { %236 = dma.done.wait [#allocation3], 128  }
   0x9   :  { %237 = vsyncadd [#allocation3], 4294967168 }
   0xa   :  { %238 = dma.done.wait [#allocation5], 8704  }
   0xb   :  { %239 = vsyncadd [#allocation5], 4294958592  ;;  %vm50_vm0 = vcmask 1042432   ;;  %v43_v0 = vld [vmem:[#allocation4 + $0x8] sm:$0x7]  ;;  %v42_v1 = vld [vmem:[#allocation4] sm:$0xff] }
   0xc   :  { %175 = vmatpush.msk.msra.mxu0 %vm50_vm0, %v43_v0  ;;  %v41_v2 = vld [vmem:[#allocation2] sm:$0xff]  ;;  %vm46_vm1 = vcmask 89088   ;;  %v92_v3 = vld [vmem:[#allocation4 + $0x100] sm:$0xff]  ;;  %v90_v5 = vld [vmem:[#allocation4 + $0xf0] sm:$0xff]  ;;  %vm167_vm2 = vcmask 7168  }
   0xd   :  { %v91_v4 = vld [vmem:[#allocation4 + $0xf8] sm:$0xff]  ;;  %95 = vmatpush.msra.mxu1 %v92_v3  ;;  %v89_v6 = vld [vmem:[#allocation4 + $0xe8] sm:$0xff]  ;;  %v88_v7 = vld [vmem:[#allocation4 + $0xe0] sm:$0xff] }
   0xe   :  { %69 = vmatpush.msra.mxu0 %v42_v1  ;;  %v87_v8 = vld [vmem:[#allocation4 + $0xd8] sm:$0xff]  ;;  %v86_v9 = vld [vmem:[#allocation4 + $0xd0] sm:$0xff]  ;;  %v85_v10 = vld [vmem:[#allocation4 + $0xc8] sm:$0xff] }
   0xf   :  { %176 = vmatmul.msk.f32.vlgmr.msra.gmra.mxu0 %vm46_vm1, %v41_v2  ;;  %96 = vmatpush.msra.mxu1 %v91_v4  ;;  %v84_v11 = vld [vmem:[#allocation4 + $0xc0] sm:$0xff]  ;;  %v83_v12 = vld [vmem:[#allocation4 + $0xb8] sm:$0xff]  ;;  %v82_v13 = vld [vmem:[#allocation4 + $0xb0] sm:$0xff] }
  0x10   :  { %v81_v14 = vld [vmem:[#allocation4 + $0xa8] sm:$0xff]  ;;  %v80_v15 = vld [vmem:[#allocation4 + $0xa0] sm:$0xff]  ;;  %v79_v16 = vld [vmem:[#allocation4 + $0x98] sm:$0xff] }
  0x11   :  { %97 = vmatpush.msra.mxu1 %v90_v5  ;;  %v78_v17 = vld [vmem:[#allocation4 + $0x90] sm:$0xff]  ;;  %v77_v18 = vld [vmem:[#allocation4 + $0x88] sm:$0xff]  ;;  %v132_v20 = vld [vmem:[#allocation4 + $0x180] sm:$0xff] }
  0x12   :  { %v133_v19 = vld [vmem:[#allocation4 + $0x188] sm:$0xff]  ;;  %v131_v21 = vld [vmem:[#allocation4 + $0x178] sm:$0xff]  ;;  %v130_v22 = vld [vmem:[#allocation4 + $0x170] sm:$0xff] }
  0x13   :  { %98 = vmatpush.msra.mxu1 %v89_v6  ;;  %136 = vmatpush.msra.mxu2 %v133_v19  ;;  %v129_v23 = vld [vmem:[#allocation4 + $0x168] sm:$0xff]  ;;  %v128_v24 = vld [vmem:[#allocation4 + $0x160] sm:$0xff]  ;;  %v127_v25 = vld [vmem:[#allocation4 + $0x158] sm:$0xff] }
  0x14   :  { %v126_v26 = vld [vmem:[#allocation4 + $0x150] sm:$0xff]  ;;  %v125_v27 = vld [vmem:[#allocation4 + $0x148] sm:$0xff]  ;;  %v124_v28 = vld [vmem:[#allocation4 + $0x140] sm:$0xff] }
  0x15   :  { %99 = vmatpush.msra.mxu1 %v88_v7  ;;  %137 = vmatpush.msra.mxu2 %v132_v20  ;;  %v123_v29 = vld [vmem:[#allocation4 + $0x138] sm:$0xff]  ;;  %v122_v30 = vld [vmem:[#allocation4 + $0x130] sm:$0xff]  ;;  %v181_v31 = vld [vmem:[#allocation4 + $0x80] ss:$0 sm:$0xff] }
  0x16   :  { %v121_v36 = vld [vmem:[#allocation4 + $0x128] sm:$0xff]  ;;  %v120_v37 = vld [vmem:[#allocation4 + $0x120] sm:$0xff]  ;;  %v119_v38 = vld [vmem:[#allocation4 + $0x118] sm:$0xff] }
  0x17   :  { %100 = vmatpush.msra.mxu1 %v87_v8  ;;  %138 = vmatpush.msra.mxu2 %v131_v21  ;;  %v118_v39 = vld [vmem:[#allocation4 + $0x110] sm:$0xff]  ;;  %v182_v40 = vld [vmem:[#allocation4 + $0x108] ss:$0 sm:$0xff]  ;;  %v184_v48 = vld [vmem:[#allocation4 + $0x198] ss:$0 sm:$0xff] }
  0x18   :  { %v183_v45 = vld [vmem:[#allocation4 + $0x190] ss:$0 sm:$0xff]  ;;  %v185_v51 = vld [vmem:[#allocation4 + $0x218] ss:$0 sm:$0xff] }
  0x19   :  { %101 = vmatpush.msra.mxu1 %v86_v9  ;;  %139 = vmatpush.msra.mxu2 %v130_v22 }
  0x1b   :  { %102 = vmatpush.msra.mxu1 %v85_v10  ;;  %140 = vmatpush.msra.mxu2 %v129_v23 }
  0x1d   :  { %103 = vmatpush.msra.mxu1 %v84_v11  ;;  %141 = vmatpush.msra.mxu2 %v128_v24 }
  0x1f   :  { %104 = vmatpush.msra.mxu1 %v83_v12  ;;  %142 = vmatpush.msra.mxu2 %v127_v25 }
  0x21   :  { %105 = vmatpush.msra.mxu1 %v82_v13  ;;  %143 = vmatpush.msra.mxu2 %v126_v26 }
  0x23   :  { %106 = vmatpush.msra.mxu1 %v81_v14  ;;  %144 = vmatpush.msra.mxu2 %v125_v27 }
  0x25   :  { %107 = vmatpush.msra.mxu1 %v80_v15  ;;  %145 = vmatpush.msra.mxu2 %v124_v28 }
  0x27   :  { %108 = vmatpush.msra.mxu1 %v79_v16  ;;  %146 = vmatpush.msra.mxu2 %v123_v29 }
  0x29   :  { %109 = vmatpush.msra.mxu1 %v78_v17  ;;  %147 = vmatpush.msra.mxu2 %v122_v30 }
  0x2b   :  { %110 = vmatpush.msra.mxu1 %v77_v18  ;;  %148 = vmatpush.msra.mxu2 %v121_v36 }
  0x2d   :  { %149 = vmatpush.msra.mxu2 %v120_v37 }
  0x2f   :  { %150 = vmatpush.msra.mxu2 %v119_v38 }
  0x31   :  { %151 = vmatpush.msra.mxu2 %v118_v39 }
  0x8c   :  { %v71_v32 = vpop.f32.mrf.mxu0 }
  0x8d   :  { %v72_v33 = vadd.f32 %v181_v31, %v71_v32 }
  0x8f   :  { %v74_v34 = vmul.f32 0.01, %v72_v33 }
  0x91   :  { %v75_v35 = vmax.f32 %v72_v33, %v74_v34 }
  0x93   :  { %111 = vmatmul.f32.vlgmr.msra.gmra.mxu1 %v75_v35 }
 0x110   :  { %v112_v41 = vpop.f32.mrf.mxu1 }
 0x111   :  { %v113_v42 = vadd.f32 %v182_v40, %v112_v41 }
 0x113   :  { %v115_v43 = vmul.f32 0.01, %v113_v42 }
 0x115   :  { %v116_v44 = vmax.f32 %v113_v42, %v115_v43 }
 0x117   :  { %152 = vmatmul.f32.vlgmr.msra.gmra.mxu2 %v116_v44 }
 0x19a   :  { %v153_v46 = vpop.f32.mrf.mxu2 }
 0x19b   :  { %v154_v47 = vadd.f32 %v183_v45, %v153_v46 }
 0x19d   :  { %v156_v49 = vmax.f32 %v154_v47, 0.0 }
 0x19f   :  { %v161_v50 = vmul.f32 %v184_v48, %v156_v49 }
 0x1a1   :  { %162 = vadd.xlane.f32.xlu0 %v161_v50 }
 0x214   :  { %v163_v52 = vpop.xlane.xlu0 %162 }
 0x215   :  { %v165_v53 = vadd.f32 %v185_v51, %v163_v52 }
 0x217   :  { %186 = vtanh.f32 %v165_v53 }
 0x21d   :  { %v187_v54 = vpop.eup %186 }
 0x21e   :  { %168 = vst.msk [vmem:[%s270_s2] sm:$0xff] %vm167_vm2, %v187_v54 }
 0x21f   :  { %173 = vsyncpa [#allocation3], 1 }
 0x220   :  { %174 = vsyncpa [#allocation5], 1 }

</bundles_post_ra>
